<compile_context>
chip_gen: v7x
topology: tpu7x:2x2x1
jax: 0.10.0
libtpu: 0.0.40
codegen_flags: <defaults>
</compile_context>

<pallas_src>
import jax
import jax.numpy as jnp
from jax.experimental import pallas as pl
from jax.experimental.pallas import tpu as pltpu

_LANE = 128      # lane (last-dim) granularity
_SUBLANE = 8     # sublane granularity


def _round_up(n, mult):
    return ((n + mult - 1) // mult) * mult


def _mlp_kernel(x_ref, w1_ref, b1_ref, w2_ref, b2_ref, w3_ref, b3_ref, o_ref):
    # x_ref: (TM, D_in_p) bf16; w*: bf16, lane-padded; b*: (1, dim) f32.
    # Matmuls run bf16 x bf16 -> f32 on the MXU; elementwise stays f32.
    x = x_ref[...]

    h1 = jnp.dot(x, w1_ref[...], preferred_element_type=jnp.float32) + b1_ref[...]
    h1 = jnp.maximum(h1, 0.0)

    h2 = jnp.dot(h1.astype(jnp.bfloat16), w2_ref[...],
                 preferred_element_type=jnp.float32) + b2_ref[...]
    h2 = jnp.maximum(h2, 0.0)

    h3 = jnp.dot(h2.astype(jnp.bfloat16), w3_ref[...],
                 preferred_element_type=jnp.float32) + b3_ref[...]
    h3 = jnp.maximum(h3, 0.0)

    o_ref[...] = h3.astype(o_ref.dtype)


def time_series_model_forward(x, params, *, tile_m=512):
    """x: (batch, seq, input_dim) f32. Returns (batch, seq, output_dim) f32."""
    w1, b1 = params["w1"], params["b1"]   # (D_in, H), (H,)
    w2, b2 = params["w2"], params["b2"]   # (H, H),   (H,)
    w3, b3 = params["w3"], params["b3"]   # (H, D_out), (D_out,)

    batch, seq, d_in = x.shape
    hidden = w1.shape[1]
    d_out = w3.shape[1]

    # Lane-pad feature dims to multiples of 128 (zero padding is exact here:
    # zero input cols x zero weight rows contribute 0, and ReLU(0 bias) = 0).
    d_in_p = _round_up(d_in, _LANE)
    h_p = _round_up(hidden, _LANE)
    d_out_p = _round_up(d_out, _LANE)

    m = batch * seq
    tm = min(tile_m, _round_up(m, _SUBLANE))   # large row tiles, multiple of 8
    m_p = _round_up(m, tm)
    grid_m = m_p // tm

    # --- pad + cast operands on the wrapper side ---
    x2d = jnp.pad(x.reshape(m, d_in).astype(jnp.bfloat16),
                  ((0, m_p - m), (0, d_in_p - d_in)))

    def pad_w(w, rp, cp):
        return jnp.pad(w.astype(jnp.bfloat16),
                       ((0, rp - w.shape[0]), (0, cp - w.shape[1])))

    def pad_b(b, cp):
        return jnp.pad(b.astype(jnp.float32),
                       ((0, cp - b.shape[0]),)).reshape(1, cp)

    w1p, w2p, w3p = pad_w(w1, d_in_p, h_p), pad_w(w2, h_p, h_p), pad_w(w3, h_p, d_out_p)
    b1p, b2p, b3p = pad_b(b1, h_p), pad_b(b2, h_p), pad_b(b3, d_out_p)

    # --- explicit VMEM budget: resident weights + double-buffered x/out tiles
    #     + f32/bf16 intermediates, with headroom; capped at 64 MiB for v7x. ---
    bf16, f32 = 2, 4
    weights_bytes = (w1p.size + w2p.size + w3p.size) * bf16 \
        + (b1p.size + b2p.size + b3p.size) * f32
    io_bytes = 2 * tm * d_in_p * bf16 + 2 * tm * d_out_p * f32
    interm_bytes = 3 * tm * h_p * f32
    vmem_limit = int(1.5 * (2 * weights_bytes + io_bytes + interm_bytes)) + (4 << 20)
    vmem_limit = max(32 << 20, min(vmem_limit, 64 << 20))
    # TODO(synk): if hidden_dim grows so large that resident bf16 weights alone
    # blow the 64 MiB v7x budget, add a K/N grid axis with an f32 accumulator
    # (pl.when init/finalize) instead of keeping all three matrices resident.

    grid_spec = pltpu.PrefetchScalarGridSpec(
        num_scalar_prefetch=0,
        grid=(grid_m,),
        in_specs=[
            pl.BlockSpec((tm, d_in_p), lambda i: (i, 0)),       # x tile (pipelined)
            pl.BlockSpec((d_in_p, h_p), lambda i: (0, 0)),      # W1 (resident)
            pl.BlockSpec((1, h_p), lambda i: (0, 0)),           # b1
            pl.BlockSpec((h_p, h_p), lambda i: (0, 0)),         # W2
            pl.BlockSpec((1, h_p), lambda i: (0, 0)),           # b2
            pl.BlockSpec((h_p, d_out_p), lambda i: (0, 0)),     # W3
            pl.BlockSpec((1, d_out_p), lambda i: (0, 0)),       # b3
        ],
        out_specs=pl.BlockSpec((tm, d_out_p), lambda i: (i, 0)),
    )

    out2d = pl.pallas_call(
        _mlp_kernel,
        out_shape=jax.ShapeDtypeStruct((m_p, d_out_p), jnp.float32),
        grid_spec=grid_spec,
        compiler_params=pltpu.CompilerParams(
            dimension_semantics=("parallel",),      # M tiles are independent
            vmem_limit_bytes=vmem_limit),
    )(x2d, w1p, b1p, w2p, b2p, w3p, b3p)

    return out2d[:m, :d_out].reshape(batch, seq, d_out)


def _xavier_uniform(key, fan_in, fan_out):
    # torch.nn.init.xavier_uniform_ (gain=1); stored as (fan_in, fan_out) for x @ W.
    a = jnp.sqrt(6.0 / (fan_in + fan_out))
    return jax.random.uniform(key, (fan_in, fan_out), jnp.float32, -a, a)


def init_params(key, input_dim, hidden_dim, output_dim):
    k1, k2, k3, kb1, kb2, kb3 = jax.random.split(key, 6)

    def bias(k, fan_in, dim):
        # PyTorch Linear default bias init (init_params only touches dim>1 params).
        bound = 1.0 / jnp.sqrt(fan_in)
        return jax.random.uniform(k, (dim,), jnp.float32, -bound, bound)

    return {
        "w1": _xavier_uniform(k1, input_dim, hidden_dim),
        "b1": bias(kb1, input_dim, hidden_dim),
        "w2": _xavier_uniform(k2, hidden_dim, hidden_dim),
        "b2": bias(kb2, hidden_dim, hidden_dim),
        "w3": _xavier_uniform(k3, hidden_dim, output_dim),
        "b3": bias(kb3, hidden_dim, output_dim),
    }


def _reference_forward(x, p):
    # Full-f32 reference matching TimeSeriesModel.forward (ReLU after every Linear,
    # including the final cls layer, exactly as in the PyTorch module).
    h = jnp.maximum(x @ p["w1"] + p["b1"], 0.0)
    h = jnp.maximum(h @ p["w2"] + p["b2"], 0.0)
    h = jnp.maximum(h @ p["w3"] + p["b3"], 0.0)
    return h


if __name__ == "__main__":
    batch, seq, input_dim, hidden_dim, output_dim = 2, 8, 16, 32, 8

    key = jax.random.PRNGKey(0)
    kx, kp = jax.random.split(key)
    x = jax.random.normal(kx, (batch, seq, input_dim), jnp.float32)
    params = init_params(kp, input_dim, hidden_dim, output_dim)

    out = time_series_model_forward(x, params)
    out = jax.block_until_ready(out)

    ref = _reference_forward(x, params)
    assert out.shape == (batch, seq, output_dim)
    # bf16 matmuls with f32 accumulation -> relaxed tolerance vs the f32 reference.
    assert jnp.allclose(out, ref, atol=2e-2, rtol=2e-2), "mismatch vs reference"

    print("KERNEL_OK")
</pallas_src>

<mosaic_0001>
module attributes {stable_mosaic.version = 11 : i64} {
  func.func @_mlp_kernel(%arg0: i32, %arg1: memref<16x128xbf16, #tpu.memory_space<vmem>>, %arg2: memref<128x128xbf16, #tpu.memory_space<vmem>>, %arg3: memref<1x128xf32, #tpu.memory_space<vmem>>, %arg4: memref<128x128xbf16, #tpu.memory_space<vmem>>, %arg5: memref<1x128xf32, #tpu.memory_space<vmem>>, %arg6: memref<128x128xbf16, #tpu.memory_space<vmem>>, %arg7: memref<1x128xf32, #tpu.memory_space<vmem>>, %arg8: memref<16x128xf32, #tpu.memory_space<vmem>>) attributes {dimension_semantics = [#tpu.dimension_semantics<parallel>], iteration_bounds = array<i64: 1>, scalar_prefetch = 0 : i64, scratch_operands = 0 : i64, tpu.core_type = #tpu.core_type<tc>, window_params = [{transform_indices = @transform_0, window_bounds = array<i64: 16, 128>}, {pipeline_mode = #tpu.pipeline_mode<synchronous>, transform_indices = @transform_1, window_bounds = array<i64: 128, 128>}, {pipeline_mode = #tpu.pipeline_mode<synchronous>, transform_indices = @transform_2, window_bounds = array<i64: 1, 128>}, {pipeline_mode = #tpu.pipeline_mode<synchronous>, transform_indices = @transform_3, window_bounds = array<i64: 128, 128>}, {pipeline_mode = #tpu.pipeline_mode<synchronous>, transform_indices = @transform_4, window_bounds = array<i64: 1, 128>}, {pipeline_mode = #tpu.pipeline_mode<synchronous>, transform_indices = @transform_5, window_bounds = array<i64: 128, 128>}, {pipeline_mode = #tpu.pipeline_mode<synchronous>, transform_indices = @transform_6, window_bounds = array<i64: 1, 128>}, {transform_indices = @transform_7, window_bounds = array<i64: 16, 128>}]} {
    %c0 = arith.constant 0 : index
    %c0_0 = arith.constant 0 : index
    %0 = vector.load %arg1[%c0, %c0_0] : memref<16x128xbf16, #tpu.memory_space<vmem>>, vector<16x128xbf16>
    %c0_1 = arith.constant 0 : index
    %c0_2 = arith.constant 0 : index
    %1 = vector.load %arg2[%c0_1, %c0_2] : memref<128x128xbf16, #tpu.memory_space<vmem>>, vector<128x128xbf16>
    %cst = arith.constant dense<0.000000e+00> : vector<16x128xf32>
    %2 = tpu.matmul %0, %1, %cst {dimension_numbers = #tpu.dot_dimension_numbers<[1], [0], [0], [1], [0, 0, 1, 1], [], []>} : vector<16x128xbf16>, vector<128x128xbf16>, vector<16x128xf32> -> vector<16x128xf32>
    %c0_3 = arith.constant 0 : index
    %c0_4 = arith.constant 0 : index
    %3 = vector.load %arg3[%c0_3, %c0_4] : memref<1x128xf32, #tpu.memory_space<vmem>>, vector<1x128xf32>
    %4 = vector.broadcast %3 : vector<1x128xf32> to vector<16x128xf32>
    %5 = arith.addf %2, %4 : vector<16x128xf32>
    %cst_5 = arith.constant 0.000000e+00 : f32
    %6 = vector.broadcast %cst_5 : f32 to vector<16x128xf32>
    %7 = arith.maximumf %5, %6 : vector<16x128xf32>
    %8 = arith.truncf %7 : vector<16x128xf32> to vector<16x128xbf16>
    %c0_6 = arith.constant 0 : index
    %c0_7 = arith.constant 0 : index
    %9 = vector.load %arg4[%c0_6, %c0_7] : memref<128x128xbf16, #tpu.memory_space<vmem>>, vector<128x128xbf16>
    %cst_8 = arith.constant dense<0.000000e+00> : vector<16x128xf32>
    %10 = tpu.matmul %8, %9, %cst_8 {dimension_numbers = #tpu.dot_dimension_numbers<[1], [0], [0], [1], [0, 0, 1, 1], [], []>} : vector<16x128xbf16>, vector<128x128xbf16>, vector<16x128xf32> -> vector<16x128xf32>
    %c0_9 = arith.constant 0 : index
    %c0_10 = arith.constant 0 : index
    %11 = vector.load %arg5[%c0_9, %c0_10] : memref<1x128xf32, #tpu.memory_space<vmem>>, vector<1x128xf32>
    %12 = vector.broadcast %11 : vector<1x128xf32> to vector<16x128xf32>
    %13 = arith.addf %10, %12 : vector<16x128xf32>
    %cst_11 = arith.constant 0.000000e+00 : f32
    %14 = vector.broadcast %cst_11 : f32 to vector<16x128xf32>
    %15 = arith.maximumf %13, %14 : vector<16x128xf32>
    %16 = arith.truncf %15 : vector<16x128xf32> to vector<16x128xbf16>
    %c0_12 = arith.constant 0 : index
    %c0_13 = arith.constant 0 : index
    %17 = vector.load %arg6[%c0_12, %c0_13] : memref<128x128xbf16, #tpu.memory_space<vmem>>, vector<128x128xbf16>
    %cst_14 = arith.constant dense<0.000000e+00> : vector<16x128xf32>
    %18 = tpu.matmul %16, %17, %cst_14 {dimension_numbers = #tpu.dot_dimension_numbers<[1], [0], [0], [1], [0, 0, 1, 1], [], []>} : vector<16x128xbf16>, vector<128x128xbf16>, vector<16x128xf32> -> vector<16x128xf32>
    %c0_15 = arith.constant 0 : index
    %c0_16 = arith.constant 0 : index
    %19 = vector.load %arg7[%c0_15, %c0_16] : memref<1x128xf32, #tpu.memory_space<vmem>>, vector<1x128xf32>
    %20 = vector.broadcast %19 : vector<1x128xf32> to vector<16x128xf32>
    %21 = arith.addf %18, %20 : vector<16x128xf32>
    %cst_17 = arith.constant 0.000000e+00 : f32
    %22 = vector.broadcast %cst_17 : f32 to vector<16x128xf32>
    %23 = arith.maximumf %21, %22 : vector<16x128xf32>
    %c0_18 = arith.constant 0 : index
    %c0_19 = arith.constant 0 : index
    %24 = vector.load %arg8[%c0_18, %c0_19] : memref<16x128xf32, #tpu.memory_space<vmem>>, vector<16x128xf32>
    tpu.vector_store %arg8[%c0_18, %c0_19], %23 {strides = array<i32>} : memref<16x128xf32, #tpu.memory_space<vmem>>, vector<16x128xf32>,
    return
  }
  func.func @transform_0(%arg0: i32) -> (i32, i32) {
    %c0_i32 = arith.constant 0 : i32
    %c0_i32_0 = arith.constant 0 : i32
    return %arg0, %c0_i32 : i32, i32
  }
  func.func @transform_1(%arg0: i32) -> (i32, i32) {
    %c0_i32 = arith.constant 0 : i32
    %c0_i32_0 = arith.constant 0 : i32
    %c0_i32_1 = arith.constant 0 : i32
    return %c0_i32, %c0_i32_0 : i32, i32
  }
  func.func @transform_2(%arg0: i32) -> (i32, i32) {
    %c0_i32 = arith.constant 0 : i32
    %c0_i32_0 = arith.constant 0 : i32
    %c0_i32_1 = arith.constant 0 : i32
    return %c0_i32, %c0_i32_0 : i32, i32
  }
  func.func @transform_3(%arg0: i32) -> (i32, i32) {
    %c0_i32 = arith.constant 0 : i32
    %c0_i32_0 = arith.constant 0 : i32
    %c0_i32_1 = arith.constant 0 : i32
    return %c0_i32, %c0_i32_0 : i32, i32
  }
  func.func @transform_4(%arg0: i32) -> (i32, i32) {
    %c0_i32 = arith.constant 0 : i32
    %c0_i32_0 = arith.constant 0 : i32
    %c0_i32_1 = arith.constant 0 : i32
    return %c0_i32, %c0_i32_0 : i32, i32
  }
  func.func @transform_5(%arg0: i32) -> (i32, i32) {
    %c0_i32 = arith.constant 0 : i32
    %c0_i32_0 = arith.constant 0 : i32
    %c0_i32_1 = arith.constant 0 : i32
    return %c0_i32, %c0_i32_0 : i32, i32
  }
  func.func @transform_6(%arg0: i32) -> (i32, i32) {
    %c0_i32 = arith.constant 0 : i32
    %c0_i32_0 = arith.constant 0 : i32
    %c0_i32_1 = arith.constant 0 : i32
    return %c0_i32, %c0_i32_0 : i32, i32
  }
  func.func @transform_7(%arg0: i32) -> (i32, i32) {
    %c0_i32 = arith.constant 0 : i32
    %c0_i32_0 = arith.constant 0 : i32
    return %arg0, %c0_i32 : i32, i32
  }
}

</mosaic_0001>

<bundles_post_ra>
// kernel: tpu_custom_call.1
= control target key start
LH: loop header
LB: loop body
LE: loop exit
PB: predicated region body
PF: predicated region fallthrough
CT: control target
= control target key end

     0   :  { %12 = vsyncpa [#allocation3], 0  ;;  %s901_s0 = inlined_call_operand.hbm [shape: bf16[16,128], index: 0, kind: input, shape index: {}]   ;;  %s902_s1 = inlined_call_operand.hbm [shape: bf16[128,128], index: 1, kind: input, shape index: {}]   ;;  %s903_s2 = inlined_call_operand.vmem [shape: f32[1,128], index: 2, kind: input, shape index: {}]   ;;  %s904_s3 = inlined_call_operand.hbm [shape: bf16[128,128], index: 3, kind: input, shape index: {}]   ;;  %s905_s4 = inlined_call_operand.vmem [shape: f32[1,128], index: 4, kind: input, shape index: {}]   ;;  %s906_s5 = inlined_call_operand.hbm [shape: bf16[128,128], index: 5, kind: input, shape index: {}]   ;;  %s907_s6 = inlined_call_operand.vmem [shape: f32[1,128], index: 6, kind: input, shape index: {}]   ;;  %s908_s7 = inlined_call_operand.hbm [shape: f32[16,128], index: 7, kind: output, shape index: {}]  }
   0x1   :  { %13 = vsyncpa [#allocation6], 0 }
   0x2   :  { %14 = vsyncpa [#allocation9], 0 }
   0x3   :  { %15 = vsyncpa [#allocation4], 0  ;;  %s725_s24 = smov [#allocation5]   ;;  %s726_s26 = smov [#allocation2]  }
   0x4   :  { %s33_s25 = sshll.u32 %s725_s24, 4  ;;  %s21_s27 = sshll.u32 %s726_s26, 4  ;;  %s34_s25 = int_to_ptr.vmem [resolvable:$true] %s33_s25  ;;  %s776_s27 = int_to_ptr.vmem [resolvable:$true] %s21_s27 }
   0x5   :  { %s607_s30 = scalar_lea.hbm %s902_s1, 1024 }
   0x6   :  { %p608_p0 = scmp.ne.s32.totalorder %s902_s1, %s607_s30  ;;  %p611_p1 = scmp.lt.u32.totalorder %s607_s30, %s902_s1 }
   0x8   :  { %p613_p2 = pnand %p611_p1, %p608_p0 }
   0xa   :  { %616 = shalt.err (!%p613_p2)
}
   0xb   :  { %s617_s12 = scalar_lea.vmem %s34_s25, 1024  ;;  %p622_p4 = scmp.lt.s32.totalorder %s34_s25, %s34_s25 }
   0xc   :  { %p618_p3 = scmp.ne.s32.totalorder %s34_s25, %s617_s12  ;;  %p623_p5 = scmp.lt.s32.totalorder %s617_s12, %s617_s12 }
   0xe   :  { %p624_p6 = por %p623_p5, %p622_p4 }
  0x10   :  { %p625_p7 = pnand %p624_p6, %p618_p3 }
  0x12   :  { %628 = shalt.err (!%p625_p7)
}
  0x13   :  { %s727_s13 = smov 64   ;;  %s728_s14 = smov 4  }
  0x14   :  { %39 = dma.hbm_to_vmem [thread:$0]  %s902_s1, 1024, %s34_s25, [#allocation6], %s727_s13, %s727_s13, %s728_s14  }
  0x15   :  { %s629_s19 = scalar_lea.hbm %s901_s0, 128 }
  0x16   :  { %p630_p8 = scmp.ne.s32.totalorder %s901_s0, %s629_s19  ;;  %p633_p9 = scmp.lt.u32.totalorder %s629_s19, %s901_s0 }
  0x18   :  { %p635_p10 = pnand %p633_p9, %p630_p8 }
  0x1a   :  { %638 = shalt.err (!%p635_p10)
}
  0x1b   :  { %s639_s24 = scalar_lea.vmem %s776_s27, 128  ;;  %p644_p12 = scmp.lt.s32.totalorder %s776_s27, %s776_s27 }
  0x1c   :  { %p640_p11 = scmp.ne.s32.totalorder %s776_s27, %s639_s24  ;;  %p645_p13 = scmp.lt.s32.totalorder %s639_s24, %s639_s24 }
  0x1e   :  { %p646_p0 = por %p645_p13, %p644_p12 }
  0x20   :  { %p647_p1 = pnand %p646_p0, %p640_p11 }
  0x22   :  { %650 = shalt.err (!%p647_p1)
}
  0x23   :  { %27 = dma.hbm_to_vmem [thread:$0]  %s901_s0, 128, %s776_s27, [#allocation3], %s727_s13, %s727_s13, %s728_s14  }
  0x24   :  { %s729_s26 = smov [#allocation7]   ;;  %s730_s29 = smov [#allocation8]  }
  0x25   :  { %s47_s28 = sshll.u32 %s729_s26, 4  ;;  %s61_s30 = sshll.u32 %s730_s29, 4  ;;  %s48_s28 = int_to_ptr.vmem [resolvable:$true] %s47_s28  ;;  %s813_s30 = int_to_ptr.vmem [resolvable:$true] %s61_s30 }
  0x26   :  { %s651_s10 = scalar_lea.hbm %s904_s3, 1024 }
  0x27   :  { %p652_p2 = scmp.ne.s32.totalorder %s904_s3, %s651_s10  ;;  %p655_p3 = scmp.lt.u32.totalorder %s651_s10, %s904_s3 }
  0x29   :  { %p657_p4 = pnand %p655_p3, %p652_p2 }
  0x2b   :  { %660 = shalt.err (!%p657_p4)
}
  0x2c   :  { %s661_s0 = scalar_lea.vmem %s48_s28, 1024  ;;  %p666_p6 = scmp.lt.s32.totalorder %s48_s28, %s48_s28 }
  0x2d   :  { %p662_p5 = scmp.ne.s32.totalorder %s48_s28, %s661_s0  ;;  %p667_p7 = scmp.lt.s32.totalorder %s661_s0, %s661_s0 }
  0x2f   :  { %p668_p8 = por %p667_p7, %p666_p6 }
  0x31   :  { %p669_p9 = pnand %p668_p8, %p662_p5 }
  0x33   :  { %672 = shalt.err (!%p669_p9)
}
  0x34   :  { %53 = dma.hbm_to_vmem [thread:$0]  %s904_s3, 1024, %s48_s28, [#allocation6], %s727_s13, %s727_s13, %s728_s14  }
  0x35   :  { %s673_s20 = scalar_lea.hbm %s906_s5, 1024 }
  0x36   :  { %p674_p10 = scmp.ne.s32.totalorder %s906_s5, %s673_s20  ;;  %p677_p11 = scmp.lt.u32.totalorder %s673_s20, %s906_s5 }
  0x38   :  { %p679_p12 = pnand %p677_p11, %p674_p10 }
  0x3a   :  { %682 = shalt.err (!%p679_p12)
}
  0x3b   :  { %s683_s1 = scalar_lea.vmem %s813_s30, 1024  ;;  %p688_p0 = scmp.lt.s32.totalorder %s813_s30, %s813_s30 }
  0x3c   :  { %p684_p13 = scmp.ne.s32.totalorder %s813_s30, %s683_s1  ;;  %p689_p1 = scmp.lt.s32.totalorder %s683_s1, %s683_s1 }
  0x3e   :  { %p690_p2 = por %p689_p1, %p688_p0 }
  0x40   :  { %p691_p3 = pnand %p690_p2, %p684_p13 }
  0x42   :  { %694 = shalt.err (!%p691_p3)
}
  0x43   :  { %67 = dma.hbm_to_vmem [thread:$0]  %s906_s5, 1024, %s813_s30, [#allocation9], %s727_s13, %s727_s13, %s728_s14  }
  0x44   :  { %717 = dma.done.wait [#allocation3], 128  }
  0x45   :  { %718 = vsyncadd [#allocation3], 4294967168 }
  0x46   :  { %719 = dma.done.wait [#allocation6], 2048  }
  0x47   :  { %720 = vsyncadd [#allocation6], 4294965248 }
  0x48   :  { %721 = dma.done.wait [#allocation9], 1024  }
  0x49   :  { %722 = vsyncadd [#allocation9], 4294966272  ;;  %v731_v0 = vmov 0.0   ;;  %vm732_vm0 = vmmov 0   ;;  %v582_v1 = vld [vmem:[#allocation5] sm:$0xff]   ;;  %v583_v2 = vld [vmem:[#allocation5 + $0x8] sm:$0xff]  }
  0x4a   :  { %511 = vmatprep.subr.bf16.mxu0 %v731_v0  ;;  %527 = vmatprep.mubr.msk.bf16.mxu0 %vm732_vm0, %v731_v0  ;;  %v584_v3 = vld [vmem:[#allocation5 + $0x10] sm:$0xff]   ;;  %v591_v4 = vld [vmem:[#allocation7] sm:$0xff]   ;;  %v585_v5 = vld [vmem:[#allocation5 + $0x18] sm:$0xff]   ;;  %s733_s29 = smov [#allocation10]  }
  0x4b   :  { %531 = vmatprep.subr.bf16.mxu1 %v731_v0  ;;  %547 = vmatprep.mubr.msk.bf16.mxu1 %vm732_vm0, %v731_v0  ;;  %v592_v6 = vld [vmem:[#allocation7 + $0x8] sm:$0xff]   ;;  %v586_v7 = vld [vmem:[#allocation5 + $0x20] sm:$0xff]   ;;  %v593_v8 = vld [vmem:[#allocation7 + $0x10] sm:$0xff]   ;;  %s442_s30 = sshll.u32 %s733_s29, 4  ;;  %s443_s30 = int_to_ptr.vmem [resolvable:$true] %s442_s30 }
  0x4c   :  { %512 = vmatpush3.bf16.msra.mxu0 %v582_v1  ;;  %532 = vmatpush3.bf16.msra.mxu1 %v591_v4  ;;  %v587_v9 = vld [vmem:[#allocation5 + $0x28] sm:$0xff]   ;;  %v594_v10 = vld [vmem:[#allocation7 + $0x18] sm:$0xff]   ;;  %v588_v11 = vld [vmem:[#allocation5 + $0x30] sm:$0xff]   ;;  %p700_p5 = scmp.lt.s32.totalorder %s443_s30, %s443_s30 }
  0x4d   :  { %513 = vmatprep.subr.bf16.mxu0 %v731_v0  ;;  %533 = vmatprep.subr.bf16.mxu1 %v731_v0  ;;  %v595_v12 = vld [vmem:[#allocation7 + $0x20] sm:$0xff]   ;;  %v589_v13 = vld [vmem:[#allocation5 + $0x38] sm:$0xff]   ;;  %v596_v14 = vld [vmem:[#allocation7 + $0x28] sm:$0xff]  }
  0x4e   :  { %v590_v15 = vld [vmem:[#allocation2] sm:$0xff]   ;;  %v597_v16 = vld [vmem:[#allocation7 + $0x30] sm:$0xff]   ;;  %v599_v18 = vld [vmem:[#allocation8] sm:$0xff]  }
  0x4f   :  { %v598_v17 = vld [vmem:[#allocation7 + $0x38] sm:$0xff]   ;;  %v600_v19 = vld [vmem:[#allocation8 + $0x8] sm:$0xff]   ;;  %v601_v20 = vld [vmem:[#allocation8 + $0x10] sm:$0xff]  }
  0x50   :  { %514 = vmatpush3.bf16.msra.mxu0 %v583_v2  ;;  %534 = vmatpush3.bf16.msra.mxu1 %v592_v6  ;;  %v602_v21 = vld [vmem:[#allocation8 + $0x18] sm:$0xff]   ;;  %v603_v22 = vld [vmem:[#allocation8 + $0x20] sm:$0xff]   ;;  %v604_v23 = vld [vmem:[#allocation8 + $0x28] sm:$0xff]  }
  0x51   :  { %515 = vmatprep.subr.bf16.mxu0 %v731_v0  ;;  %535 = vmatprep.subr.bf16.mxu1 %v731_v0  ;;  %v456_v24 = vld [vmem:[%s903_s2] ss:$0 sm:$0xff]  ;;  %v605_v34 = vld [vmem:[#allocation8 + $0x30] sm:$0xff]  }
  0x52   :  { %v606_v35 = vld [vmem:[#allocation8 + $0x38] sm:$0xff]  }
  0x53   :  { %v466_v36 = vld [vmem:[%s905_s4] ss:$0 sm:$0xff]  ;;  %s695_s4 = scalar_lea.vmem %s443_s30, 256 }
  0x54   :  { %516 = vmatpush3.bf16.msra.mxu0 %v584_v3  ;;  %536 = vmatpush3.bf16.msra.mxu1 %v593_v8  ;;  %v475_v46 = vld [vmem:[%s907_s6] ss:$0 sm:$0xff]  ;;  %p696_p4 = scmp.ne.s32.totalorder %s443_s30, %s695_s4  ;;  %p701_p6 = scmp.lt.s32.totalorder %s695_s4, %s695_s4 }
  0x55   :  { %517 = vmatprep.subr.bf16.mxu0 %v731_v0  ;;  %537 = vmatprep.subr.bf16.mxu1 %v731_v0 }
  0x56   :  { %p702_p7 = por %p701_p6, %p700_p5 }
  0x58   :  { %518 = vmatpush3.bf16.msra.mxu0 %v585_v5  ;;  %538 = vmatpush3.bf16.msra.mxu1 %v594_v10  ;;  %p703_p8 = pnand %p702_p7, %p696_p4 }
  0x59   :  { %519 = vmatprep.subr.bf16.mxu0 %v731_v0  ;;  %539 = vmatprep.subr.bf16.mxu1 %v731_v0 }
  0x5c   :  { %520 = vmatpush3.bf16.msra.mxu0 %v586_v7  ;;  %540 = vmatpush3.bf16.msra.mxu1 %v595_v12 }
  0x5d   :  { %521 = vmatprep.subr.bf16.mxu0 %v731_v0  ;;  %541 = vmatprep.subr.bf16.mxu1 %v731_v0 }
  0x60   :  { %522 = vmatpush3.bf16.msra.mxu0 %v587_v9  ;;  %542 = vmatpush3.bf16.msra.mxu1 %v596_v14 }
  0x61   :  { %523 = vmatprep.subr.bf16.mxu0 %v731_v0  ;;  %543 = vmatprep.subr.bf16.mxu1 %v731_v0 }
  0x64   :  { %524 = vmatpush3.bf16.msra.mxu0 %v588_v11  ;;  %544 = vmatpush3.bf16.msra.mxu1 %v597_v16 }
  0x65   :  { %525 = vmatprep.subr.bf16.mxu0 %v731_v0  ;;  %545 = vmatprep.subr.bf16.mxu1 %v731_v0 }
  0x68   :  { %526 = vmatpush3.bf16.msra.mxu0 %v589_v13  ;;  %546 = vmatpush3.bf16.msra.mxu1 %v598_v17 }
  0x69   :  { %551 = vmatprep.subr.bf16.mxu0 %v731_v0 }
  0x6b   :  { %528 = vmatmul.mubr.bf16.vlgmr.msra.gmra.mrb[0].mxu0 %v590_v15 }
  0x6c   :  { %567 = vmatprep.mubr.msk.bf16.mxu0 %vm732_vm0, %v731_v0  ;;  %552 = vmatpush3.bf16.msra.mxu0 %v599_v18 }
  0x6d   :  { %553 = vmatprep.subr.bf16.mxu0 %v731_v0 }
  0x70   :  { %554 = vmatpush3.bf16.msra.mxu0 %v600_v19 }
  0x71   :  { %555 = vmatprep.subr.bf16.mxu0 %v731_v0 }
  0x74   :  { %556 = vmatpush3.bf16.msra.mxu0 %v601_v20 }
  0x75   :  { %557 = vmatprep.subr.bf16.mxu0 %v731_v0 }
  0x78   :  { %558 = vmatpush3.bf16.msra.mxu0 %v602_v21 }
  0x79   :  { %559 = vmatprep.subr.bf16.mxu0 %v731_v0 }
  0x7c   :  { %560 = vmatpush3.bf16.msra.mxu0 %v603_v22 }
  0x7d   :  { %561 = vmatprep.subr.bf16.mxu0 %v731_v0 }
  0x80   :  { %562 = vmatpush3.bf16.msra.mxu0 %v604_v23 }
  0x81   :  { %563 = vmatprep.subr.bf16.mxu0 %v731_v0 }
  0x84   :  { %564 = vmatpush3.bf16.msra.mxu0 %v605_v34 }
  0x85   :  { %565 = vmatprep.subr.bf16.mxu0 %v731_v0 }
  0x88   :  { %566 = vmatpush3.bf16.msra.mxu0 %v606_v35 }
 0x13e   :  { %v196_v25 = vpop.f32.mrb[0].mxu0 }
 0x13f   :  { %v197_v26 = vadd.f32 %v456_v24, %v196_v25  ;;  %v529_v27 = vpop.f32.mrb[1].mxu0 }
 0x140   :  { %v199_v28 = vpop.f32.mrb[2].mxu0 }
 0x141   :  { %v200_v29 = vadd.f32 %v456_v24, %v199_v28  ;;  %v530_v30 = vpop.f32.mrb[3].mxu0  ;;  %v203_v31 = vmax.f32 %v197_v26, 0.0 }
 0x143   :  { %v204_v32 = vmax.f32 %v200_v29, 0.0 }
 0x145   :  { %v205_v33 = vpack.c.bf16 %v204_v32, %v203_v31 }
 0x147   :  { %548 = vmatmul.mubr.bf16.vlgmr.msra.gmra.mrb[0].mxu1 %v205_v33 }
 0x21a   :  { %v311_v37 = vpop.f32.mrb[0].mxu1 }
 0x21b   :  { %v312_v38 = vadd.f32 %v466_v36, %v311_v37  ;;  %v549_v39 = vpop.f32.mrb[1].mxu1 }
 0x21c   :  { %v314_v40 = vpop.f32.mrb[2].mxu1 }
 0x21d   :  { %v315_v41 = vadd.f32 %v466_v36, %v314_v40  ;;  %v550_v42 = vpop.f32.mrb[3].mxu1  ;;  %v318_v43 = vmax.f32 %v312_v38, 0.0 }
 0x21f   :  { %v319_v44 = vmax.f32 %v315_v41, 0.0 }
 0x221   :  { %v320_v45 = vpack.c.bf16 %v319_v44, %v318_v43 }
 0x223   :  { %568 = vmatmul.mubr.bf16.vlgmr.msra.gmra.mrb[4].mxu0 %v320_v45 }
 0x2f6   :  { %v426_v47 = vpop.f32.mrb[4].mxu0 }
 0x2f7   :  { %v427_v48 = vadd.f32 %v475_v46, %v426_v47  ;;  %v569_v49 = vpop.f32.mrb[5].mxu0 }
 0x2f8   :  { %v429_v50 = vpop.f32.mrb[6].mxu0 }
 0x2f9   :  { %v433_v51 = vmax.f32 %v427_v48, 0.0  ;;  %v430_v52 = vadd.f32 %v475_v46, %v429_v50  ;;  %v570_v53 = vpop.f32.mrb[7].mxu0 }
 0x2fb   :  { %435 = vst [vmem:[#allocation10] sm:$0xff] %v433_v51  ;;  %v434_v54 = vmax.f32 %v430_v52, 0.0 }
 0x2fd   :  { %436 = vst [vmem:[#allocation10 + $0x8] sm:$0xff] %v434_v54 }
 0x2fe   :  { %706 = shalt.err (!%p703_p8)
}
 0x2ff   :  { %s707_s9 = scalar_lea.hbm %s908_s7, 256 }
 0x300   :  { %p708_p9 = scmp.ne.s32.totalorder %s908_s7, %s707_s9  ;;  %p711_p10 = scmp.lt.u32.totalorder %s707_s9, %s908_s7 }
 0x302   :  { %p713_p11 = pnand %p711_p10, %p708_p9 }
 0x304   :  { %716 = shalt.err (!%p713_p11)
}
 0x305   :  { %s734_s16 = smov 128   ;;  %s735_s0 = smov 8  }
 0x306   :  { %448 = dma.vmem_to_hbm [thread:$0]  %s443_s30, 256, %s908_s7, [#allocation4], %s734_s16, %s734_s16, %s735_s0  }
 0x307   :  { %723 = dma.done.wait [#allocation4], 256  }
 0x308   :  { %724 = vsyncadd [#allocation4], 4294967040 }
 0x309   :  { %452 = vsyncpa [#allocation3], 1 }
 0x30a   :  { %453 = vsyncpa [#allocation6], 1 }
 0x30b   :  { %454 = vsyncpa [#allocation9], 1 }
 0x30c   :  { %455 = vsyncpa [#allocation4], 1 }

</bundles_post_ra>
